<compile_context>
chip_gen: v7x
topology: tpu7x:2x2x1
jax: 0.10.0
libtpu: 0.0.40
codegen_flags: <defaults>
</compile_context>

<pallas_src>
import functools

import jax
import jax.numpy as jnp
from jax import lax
from jax.experimental import pallas as pl
from jax.experimental.pallas import tpu as pltpu


def _head_kernel(x_ref, w_ref, b_ref, o_ref, *, num_heads, output_k):
    # x_ref: (B, D) f32   w_ref: (H*K, D) bf16   b_ref: (1, H*K) f32
    # o_ref: (B, H*K) f32
    hk = num_heads * output_k

    # One MXU pass for all sub-heads: contract over D (dim 1 of both operands),
    # i.e. x @ w.T with f32 accumulation.  Weights are upcast after load so the
    # HBM stream stays bf16 while the activations contribute at f32 precision.
    w = w_ref[...].astype(jnp.float32)
    logits = lax.dot_general(
        x_ref[...], w,
        dimension_numbers=(((1,), (1,)), ((), ())),
        preferred_element_type=jnp.float32,
    ) + b_ref[...]                                            # (B, H*K)

    # Softmax over each K-wide head group, computed on the whole slab:
    #   * One row-wide max.  Subtracting the same constant from every element
    #     of a row leaves each per-head softmax mathematically unchanged; the
    #     exact per-head max would only matter if one head's logits sat ~88
    #     below another head's (impossible at these scales).
    m = jnp.max(logits, axis=-1, keepdims=True)               # (B, 1)
    e = jnp.exp(logits - m)                                    # (B, H*K)

    # Per-head (segment) sums broadcast back to every lane with one tiny
    # block-diagonal one-hot matmul: denom[b, j] = sum_i e[b, i]*[head(i)==head(j)].
    # Built from iota + static per-head range compares (no integer division).
    r = lax.broadcasted_iota(jnp.int32, (hk, hk), 0)
    c = lax.broadcasted_iota(jnp.int32, (hk, hk), 1)
    seg = jnp.zeros((hk, hk), jnp.float32)
    for h in range(num_heads):                                 # static, tiny VPU work
        lo, hi = h * output_k, (h + 1) * output_k
        blk = ((r >= lo) & (r < hi)) & ((c >= lo) & (c < hi))
        seg = seg + blk.astype(jnp.float32)
    denom = lax.dot_general(
        e, seg,
        dimension_numbers=(((1,), (0,)), ((), ())),
        preferred_element_type=jnp.float32,
    )                                                          # (B, H*K)

    # EUP approx reciprocal instead of a VPU divide; single lane-dense store.
    o_ref[...] = (e * pl.reciprocal(denom, approx=True)).astype(o_ref.dtype)


def prepare_head_params(weights, biases):
    """One-time parameter packing (call OUTSIDE the forward path).

    Fuses the per-sub-head nn.Linear params into the lane-dense layout the
    kernel wants and casts the weights to bf16 exactly once, so the per-call
    HBM stream is the 184 KiB bf16 weight slab (no per-call cast round-trip).

    Args:
      weights: (H, K, D) f32 stacked torch-native (out_features, in_features).
      biases:  (H, K)    f32 stacked biases.
    Returns:
      w_fused: (H*K, D) bf16, b_fused: (1, H*K) f32.
    """
    H, K, D = weights.shape
    w_fused = jnp.asarray(weights, jnp.float32).reshape(H * K, D).astype(jnp.bfloat16)
    b_fused = jnp.asarray(biases, jnp.float32).reshape(1, H * K)
    return w_fused, b_fused


@functools.partial(jax.jit, static_argnames=("num_sub_heads", "output_k"))
def cluster_net6c_head_forward(x, w_fused, b_fused, *, num_sub_heads, output_k):
    """Pallas ClusterNet6cHead.forward (kmeans_use_features=False).

    Args:
      x:       (B, D)      f32 flattened trunk features.
      w_fused: (H*K, D)    bf16 fused weights (from prepare_head_params).
      b_fused: (1, H*K)    f32 fused biases.
    Returns:
      (H, B, K) f32 stacked softmax probabilities (unstack in the caller to
      mirror the torch module's list-of-tensors return value).
    """
    B, D = x.shape
    HK = num_sub_heads * output_k

    kernel = functools.partial(_head_kernel,
                               num_heads=num_sub_heads, output_k=output_k)
    out = pl.pallas_call(
        kernel,
        out_shape=jax.ShapeDtypeStruct((B, HK), jnp.float32),
        # Single step: whole operands resident in VMEM (<1 MiB total).
        in_specs=[
            pl.BlockSpec(memory_space=pltpu.MemorySpace.VMEM),
            pl.BlockSpec(memory_space=pltpu.MemorySpace.VMEM),
            pl.BlockSpec(memory_space=pltpu.MemorySpace.VMEM),
        ],
        out_specs=pl.BlockSpec(memory_space=pltpu.MemorySpace.VMEM),
        cost_estimate=pl.CostEstimate(
            flops=2 * B * D * HK + 2 * B * HK * HK,
            transcendentals=B * HK,
            bytes_accessed=(x.size * 4 + w_fused.size * 2
                            + b_fused.size * 4 + B * HK * 4),
        ),
    )(x, w_fused, b_fused)

    # Lane-dense (B, H*K) slab -> (H, B, K) per-head stack (tiny wrapper ops).
    return out.reshape(B, num_sub_heads, output_k).transpose(1, 0, 2)


if __name__ == "__main__":
    # Config consistent with ClusterNet6c: cfg[-1][0] = 512 features,
    # input_sz = 24 -> features_sp_size = 3, so D = 512 * 3 * 3 = 4608.
    batch = 2
    num_features = 512
    features_sp_size = 3
    in_features = num_features * features_sp_size * features_sp_size  # 4608
    output_k = 10
    num_sub_heads = 2

    key = jax.random.PRNGKey(0)
    kx, kw, kb = jax.random.split(key, 3)
    x = jax.random.normal(kx, (batch, in_features), dtype=jnp.float32)
    weights = 0.02 * jax.random.normal(
        kw, (num_sub_heads, output_k, in_features), dtype=jnp.float32)
    biases = 0.02 * jax.random.normal(
        kb, (num_sub_heads, output_k), dtype=jnp.float32)

    # One-time packing/cast, kept out of the jitted forward path.
    w_fused, b_fused = jax.block_until_ready(prepare_head_params(weights, biases))

    out = cluster_net6c_head_forward(
        x, w_fused, b_fused, num_sub_heads=num_sub_heads, output_k=output_k)
    out = jax.block_until_ready(out)

    # Unstack to mirror the torch module's list-of-tensors return value.
    results = [out[i] for i in range(num_sub_heads)]

    # Pure-JAX f32 reference. Only the bf16 weight cast and the EUP approx
    # reciprocal perturb the result (activations stay f32).
    ref_logits = jnp.einsum("bd,hkd->hbk", x, weights) + biases[:, None, :]
    ref = jax.nn.softmax(ref_logits, axis=-1)

    assert all(r.shape == (batch, output_k) for r in results)
    max_err = float(jnp.max(jnp.abs(out - ref)))
    assert jnp.allclose(out, ref, atol=1e-2, rtol=0.0), f"max_err={max_err}"
    # Softmax rows sum to ~1 (approx reciprocal -> loosened slightly).
    assert jnp.allclose(jnp.sum(out, axis=-1), 1.0, atol=5e-3)

    print("KERNEL_OK")
</pallas_src>

<mosaic_0001>
module attributes {stable_mosaic.version = 11 : i64} {
  func.func @_head_kernel(%arg0: memref<2x4608xf32, #tpu.memory_space<vmem>>, %arg1: memref<20x4608xbf16, #tpu.memory_space<vmem>>, %arg2: memref<1x20xf32, #tpu.memory_space<vmem>>, %arg3: memref<2x20xf32, #tpu.memory_space<vmem>>) attributes {dimension_semantics = [], scalar_prefetch = 0 : i64, scratch_operands = 0 : i64, tpu.core_type = #tpu.core_type<tc>} {
    %c0 = arith.constant 0 : index
    %c0_0 = arith.constant 0 : index
    %0 = vector.load %arg1[%c0, %c0_0] : memref<20x4608xbf16, #tpu.memory_space<vmem>>, vector<20x4608xbf16>
    %1 = arith.extf %0 : vector<20x4608xbf16> to vector<20x4608xf32>
    %c0_1 = arith.constant 0 : index
    %c0_2 = arith.constant 0 : index
    %2 = vector.load %arg0[%c0_1, %c0_2] : memref<2x4608xf32, #tpu.memory_space<vmem>>, vector<2x4608xf32>
    %cst = arith.constant dense<0.000000e+00> : vector<2x20xf32>
    %3 = tpu.matmul %2, %1, %cst {dimension_numbers = #tpu.dot_dimension_numbers<[1], [1], [0], [0], [0, 0, 1, 0], [], []>} : vector<2x4608xf32>, vector<20x4608xf32>, vector<2x20xf32> -> vector<2x20xf32>
    %c0_3 = arith.constant 0 : index
    %c0_4 = arith.constant 0 : index
    %4 = vector.load %arg2[%c0_3, %c0_4] : memref<1x20xf32, #tpu.memory_space<vmem>>, vector<1x20xf32>
    %5 = vector.broadcast %4 : vector<1x20xf32> to vector<2x20xf32>
    %6 = arith.addf %3, %5 : vector<2x20xf32>
    %cst_5 = arith.constant dense<0xFF800000> : vector<2xf32>
    %7 = vector.multi_reduction <maximumf>, %6, %cst_5 [1] : vector<2x20xf32> to vector<2xf32>
    %8 = vector.shape_cast %7 : vector<2xf32> to vector<2x1xf32>
    %9 = vector.broadcast %8 : vector<2x1xf32> to vector<2x20xf32>
    %10 = arith.subf %6, %9 : vector<2x20xf32>
    %11 = math.exp %10 : vector<2x20xf32>
    %12 = tpu.iota {dimensions = array<i32: 0>} : vector<20x20xi32>
    %13 = tpu.iota {dimensions = array<i32: 1>} : vector<20x20xi32>
    %cst_6 = arith.constant 0.000000e+00 : f32
    %14 = vector.broadcast %cst_6 : f32 to vector<20x20xf32>
    %c0_i32 = arith.constant 0 : i32
    %15 = vector.broadcast %c0_i32 : i32 to vector<20x20xi32>
    %16 = arith.cmpi sge, %12, %15 : vector<20x20xi32>
    %c10_i32 = arith.constant 10 : i32
    %17 = vector.broadcast %c10_i32 : i32 to vector<20x20xi32>
    %18 = arith.cmpi slt, %12, %17 : vector<20x20xi32>
    %19 = arith.andi %16, %18 : vector<20x20xi1>
    %c0_i32_7 = arith.constant 0 : i32
    %20 = vector.broadcast %c0_i32_7 : i32 to vector<20x20xi32>
    %21 = arith.cmpi sge, %13, %20 : vector<20x20xi32>
    %c10_i32_8 = arith.constant 10 : i32
    %22 = vector.broadcast %c10_i32_8 : i32 to vector<20x20xi32>
    %23 = arith.cmpi slt, %13, %22 : vector<20x20xi32>
    %24 = arith.andi %21, %23 : vector<20x20xi1>
    %25 = arith.andi %19, %24 : vector<20x20xi1>
    %26 = arith.extui %25 : vector<20x20xi1> to vector<20x20xi32>
    %27 = arith.sitofp %26 : vector<20x20xi32> to vector<20x20xf32>
    %28 = arith.addf %14, %27 : vector<20x20xf32>
    %c10_i32_9 = arith.constant 10 : i32
    %29 = vector.broadcast %c10_i32_9 : i32 to vector<20x20xi32>
    %30 = arith.cmpi sge, %12, %29 : vector<20x20xi32>
    %c20_i32 = arith.constant 20 : i32
    %31 = vector.broadcast %c20_i32 : i32 to vector<20x20xi32>
    %32 = arith.cmpi slt, %12, %31 : vector<20x20xi32>
    %33 = arith.andi %30, %32 : vector<20x20xi1>
    %c10_i32_10 = arith.constant 10 : i32
    %34 = vector.broadcast %c10_i32_10 : i32 to vector<20x20xi32>
    %35 = arith.cmpi sge, %13, %34 : vector<20x20xi32>
    %c20_i32_11 = arith.constant 20 : i32
    %36 = vector.broadcast %c20_i32_11 : i32 to vector<20x20xi32>
    %37 = arith.cmpi slt, %13, %36 : vector<20x20xi32>
    %38 = arith.andi %35, %37 : vector<20x20xi1>
    %39 = arith.andi %33, %38 : vector<20x20xi1>
    %40 = arith.extui %39 : vector<20x20xi1> to vector<20x20xi32>
    %41 = arith.sitofp %40 : vector<20x20xi32> to vector<20x20xf32>
    %42 = arith.addf %28, %41 : vector<20x20xf32>
    %cst_12 = arith.constant dense<0.000000e+00> : vector<2x20xf32>
    %43 = tpu.matmul %11, %42, %cst_12 {dimension_numbers = #tpu.dot_dimension_numbers<[1], [0], [0], [1], [0, 0, 1, 1], [], []>} : vector<2x20xf32>, vector<20x20xf32>, vector<2x20xf32> -> vector<2x20xf32>
    %44 = tpu.reciprocal %43 {approx = true} : vector<2x20xf32> -> vector<2x20xf32>
    %45 = arith.mulf %11, %44 : vector<2x20xf32>
    %c0_13 = arith.constant 0 : index
    %c0_14 = arith.constant 0 : index
    %46 = vector.load %arg3[%c0_13, %c0_14] : memref<2x20xf32, #tpu.memory_space<vmem>>, vector<2x20xf32>
    tpu.vector_store %arg3[%c0_13, %c0_14], %45 {strides = array<i32>} : memref<2x20xf32, #tpu.memory_space<vmem>>, vector<2x20xf32>,
    return
  }
}

</mosaic_0001>

<bundles_post_ra>
// kernel: cluster_net6c_head_forward.1
= control target key start
LH: loop header
LB: loop body
LE: loop exit
PB: predicated region body
PF: predicated region fallthrough
CT: control target
= control target key end

     0   :  { %8 = vsyncpa [#allocation3], 0  ;;  %s2227_s0 = inlined_call_operand.hbm [shape: f32[2,4608], index: 0, kind: input, shape index: {}]   ;;  %s2228_s1 = inlined_call_operand.hbm [shape: bf16[20,4608], index: 1, kind: input, shape index: {}]   ;;  %s2229_s2 = inlined_call_operand.vmem [shape: f32[1,20], index: 2, kind: input, shape index: {}]   ;;  %s2230_s3 = inlined_call_operand.vmem [shape: f32[2,20], index: 3, kind: output, shape index: {}]  }
   0x1   :  { %9 = vsyncpa [#allocation5], 0  ;;  %s2116_s12 = smov [#allocation2]   ;;  %s2117_s14 = smov [#allocation4]  }
   0x2   :  { %s16_s13 = sshll.u32 %s2116_s12, 4  ;;  %s25_s15 = sshll.u32 %s2117_s14, 4  ;;  %s17_s13 = int_to_ptr.vmem [resolvable:$true] %s16_s13  ;;  %s2146_s15 = int_to_ptr.vmem [resolvable:$true] %s25_s15 }
   0x3   :  { %s2068_s18 = scalar_lea.hbm %s2227_s0, 1152 }
   0x4   :  { %p2069_p0 = scmp.ne.s32.totalorder %s2227_s0, %s2068_s18  ;;  %p2072_p1 = scmp.lt.u32.totalorder %s2068_s18, %s2227_s0 }
   0x6   :  { %p2074_p2 = pnand %p2072_p1, %p2069_p0 }
   0x8   :  { %2077 = shalt.err (!%p2074_p2)
}
   0x9   :  { %s2078_s23 = scalar_lea.vmem %s17_s13, 1152  ;;  %p2083_p4 = scmp.lt.s32.totalorder %s17_s13, %s17_s13 }
   0xa   :  { %p2079_p3 = scmp.ne.s32.totalorder %s17_s13, %s2078_s23  ;;  %p2084_p5 = scmp.lt.s32.totalorder %s2078_s23, %s2078_s23 }
   0xc   :  { %p2085_p6 = por %p2084_p5, %p2083_p4 }
   0xe   :  { %p2086_p7 = pnand %p2085_p6, %p2079_p3 }
  0x10   :  { %2089 = shalt.err (!%p2086_p7)
}
  0x11   :  { %19 = dma.hbm_to_vmem [thread:$0]  %s2227_s0, 1152, %s17_s13, [#allocation3]  }
  0x12   :  { %s2090_s28 = scalar_lea.hbm %s2228_s1, 6912 }
  0x13   :  { %p2091_p8 = scmp.ne.s32.totalorder %s2228_s1, %s2090_s28  ;;  %p2094_p9 = scmp.lt.u32.totalorder %s2090_s28, %s2228_s1 }
  0x15   :  { %p2096_p10 = pnand %p2094_p9, %p2091_p8 }
  0x17   :  { %2099 = shalt.err (!%p2096_p10)
}
  0x18   :  { %s2100_s6 = scalar_lea.vmem %s2146_s15, 6912  ;;  %p2105_p12 = scmp.lt.s32.totalorder %s2146_s15, %s2146_s15 }
  0x19   :  { %p2101_p11 = scmp.ne.s32.totalorder %s2146_s15, %s2100_s6  ;;  %p2106_p13 = scmp.lt.s32.totalorder %s2100_s6, %s2100_s6 }
  0x1b   :  { %p2107_p0 = por %p2106_p13, %p2105_p12 }
  0x1d   :  { %p2108_p1 = pnand %p2107_p0, %p2101_p11 }
  0x1f   :  { %2111 = shalt.err (!%p2108_p1)
}
  0x20   :  { %s2118_s0 = smov 2304   ;;  %s2119_s7 = smov 144  }
  0x21   :  { %31 = dma.hbm_to_vmem [thread:$0]  %s2228_s1, 6912, %s2146_s15, [#allocation5], %s2118_s0, %s2118_s0, %s2119_s7  }
  0x22   :  { %2112 = dma.done.wait [#allocation3], 1152  }
  0x23   :  { %2113 = vsyncadd [#allocation3], 4294966144 }
  0x24   :  { %2114 = dma.done.wait [#allocation5], 6912  }
  0x25   :  { %2115 = vsyncadd [#allocation5], 4294960384  ;;  %v231_v0 = vlaneseq  ;;  %v2120_v1 = vmov 1983009808   ;;  %v2001_v5 = vld [vmem:[#allocation4 + $0x4] ss:$144 sps:$4 sm:$0xff]  }
  0x26   :  { %v229_v2 = vunpack.c.l.s4 %v2120_v1  ;;  %v2003_v7 = vld [vmem:[#allocation4 + $0x4c] ss:$144 sps:$4 sm:$0xff]   ;;  %1846 = vmatprep.subr.bf16.mxu1 %v2001_v5  ;;  %v2005_v8 = vld [vmem:[#allocation4] ss:$144 sps:$4 sm:$0xff]   ;;  %v2006_v9 = vld [vmem:[#allocation4 + $0x48] ss:$144 sps:$4 sm:$0xff]  }
  0x27   :  { %v2178_v4 = vshrl.u32 %v231_v0, 7  ;;  %v76_v10 = vld [vmem:[#allocation4 + $0x120] sm:$0x33]  ;;  %1882 = vmatprep.subr.bf16.mxu0 %v2003_v7  ;;  %v85_v12 = vld [vmem:[#allocation4 + $0x168] sm:$0x33]  ;;  %v202_v13 = vld [vmem:[#allocation2] sm:$0xff]  ;;  %1848 = vmatpush1.bf16.xpose.msra.mxu1 %v2005_v8 }
  0x28   :  { %v230_v3 = vunpack.c.0.s8 %v229_v2  ;;  %v167_v11 = vunpack.c.h.bf16 %v76_v10  ;;  %1884 = vmatpush1.bf16.xpose.msra.mxu0 %v2006_v9  ;;  %v185_v14 = vunpack.c.h.bf16 %v85_v12  ;;  %v206_v16 = vld [vmem:[#allocation2 + $0x20] sm:$0xff]  ;;  %v227_v17 = vcombine.high %v202_v13, %v202_v13  ;;  %v207_v24 = vld [vmem:[#allocation2 + $0x28] sm:$0xff]  ;;  %v77_v28 = vld [vmem:[#allocation4 + $0x128] sm:$0x33] }
  0x29   :  { %v295_v19 = vcombine.high %v206_v16, %v206_v16  ;;  %v166_v21 = vunpack.c.l.bf16 %v76_v10  ;;  %v184_v22 = vunpack.c.l.bf16 %v85_v12  ;;  %v2008_v25 = vld [vmem:[#allocation4 + $0xc] ss:$144 sps:$4 sm:$0xff]   ;;  %v2012_v27 = vld [vmem:[#allocation4 + $0x54] ss:$144 sps:$4 sm:$0xff]   ;;  %v2010_v32 = vld [vmem:[#allocation4 + $0x8] ss:$144 sps:$4 sm:$0xff]   ;;  %v169_v34 = vunpack.c.h.bf16 %v77_v28 }
  0x2a   :  { %v2181_v6 = vsub.s32 %v230_v3, %v2178_v4  ;;  %420 = vmatprep.subr.mxu1 %v167_v11  ;;  %1050 = vmatprep.subr.mxu0 %v185_v14  ;;  %v86_v29 = vld [vmem:[#allocation4 + $0x170] sm:$0x33]  ;;  %v312_v38 = vcombine.high %v207_v24, %v207_v24  ;;  %v203_v39 = vld [vmem:[#allocation2 + $0x8] sm:$0xff]  ;;  %v168_v40 = vunpack.c.l.bf16 %v77_v28  ;;  %v2018_v43 = vld [vmem:[#allocation4 + $0x5c] ss:$144 sps:$4 sm:$0xff]   ;;  %vm1676_vm0 = vcmask 156672  }
  0x2b   :  { %v2014_v33 = vld [vmem:[#allocation4 + $0x50] ss:$144 sps:$4 sm:$0xff]   ;;  %v187_v35 = vunpack.c.h.bf16 %v86_v29  ;;  %v186_v41 = vunpack.c.l.bf16 %v86_v29  ;;  %v2015_v42 = vld [vmem:[#allocation4 + $0x14] ss:$144 sps:$4 sm:$0xff]   ;;  %v87_v45 = vld [vmem:[#allocation4 + $0x178] sm:$0x33]  ;;  %v244_v54 = vcombine.high %v203_v39, %v203_v39 }
  0x2c   :  { %v234_v15 = vrot.slane %v202_v13, %v2181_v6  ;;  %v2185_v20 = vrot.slane %v206_v16, %v2181_v6  ;;  %v309_v23 = vrot.slane %v295_v19, %v2181_v6  ;;  %v241_v30 = vrot.slane %v227_v17, %v2181_v6  ;;  %v78_v44 = vld [vmem:[#allocation4 + $0x130] sm:$0x33]  ;;  %v2020_v49 = vld [vmem:[#allocation4 + $0x58] ss:$144 sps:$4 sm:$0xff]   ;;  %v2021_v58 = vld [vmem:[#allocation4 + $0x1c] ss:$144 sps:$4 sm:$0xff]  }
  0x2d   :  { %v319_v31 = vrot.slane %v207_v24, %v2181_v6  ;;  %v251_v46 = vrot.slane %v203_v39, %v2181_v6  ;;  %v326_v47 = vrot.slane %v312_v38, %v2181_v6  ;;  %v2017_v48 = vld [vmem:[#allocation4 + $0x10] ss:$144 sps:$4 sm:$0xff]   ;;  %v171_v50 = vunpack.c.h.bf16 %v78_v44  ;;  %v208_v55 = vld [vmem:[#allocation2 + $0x30] sm:$0xff]  ;;  %v2025_v59 = vld [vmem:[#allocation4 + $0x64] ss:$144 sps:$4 sm:$0xff]  }
  0x2e   :  { %v242_v18 = vcombine.high %v234_v15, %v234_v15  ;;  %v311_v26 = vcombine.high %v309_v23, %v309_v23  ;;  %v243_v36 = vcombine.high %v241_v30, %v241_v30  ;;  %v189_v51 = vunpack.c.h.bf16 %v87_v45  ;;  %v79_v60 = vld [vmem:[#allocation4 + $0x138] sm:$0x33]  ;;  %v88_v61 = vld [vmem:[#allocation4 + $0x180] sm:$0x33]  ;;  %v204_v10 = vld [vmem:[#allocation2 + $0x10] sm:$0xff] }
  0x2f   :  { %421 = vmatpush1.xpose.msra.mxu1 %v166_v21  ;;  %v327_v37 = vcombine.high %v319_v31, %v319_v31  ;;  %v259_v52 = vcombine.high %v251_v46, %v251_v46  ;;  %v328_v53 = vcombine.high %v326_v47, %v326_v47  ;;  %v170_v56 = vunpack.c.l.bf16 %v78_v44  ;;  %v2023_v1 = vld [vmem:[#allocation4 + $0x18] ss:$144 sps:$4 sm:$0xff]   ;;  %v2027_v2 = vld [vmem:[#allocation4 + $0x60] ss:$144 sps:$4 sm:$0xff]   ;;  %v2029_v13 = vld [vmem:[#allocation4 + $0x24] ss:$144 sps:$4 sm:$0xff]  }
  0x30   :  { %480 = vmatprep.mubr.f32.mxu1 %v242_v18  ;;  %1051 = vmatpush1.xpose.msra.mxu0 %v184_v22  ;;  %v188_v57 = vunpack.c.l.bf16 %v87_v45  ;;  %v258_v62 = vrot.slane %v244_v54, %v2181_v6  ;;  %v336_v63 = vrot.slane %v208_v55, %v2181_v6  ;;  %v173_v3 = vunpack.c.h.bf16 %v79_v60  ;;  %v2032_v14 = vld [vmem:[#allocation4 + $0x6c] ss:$144 sps:$4 sm:$0xff]   ;;  %v2031_v19 = vld [vmem:[#allocation4 + $0x20] ss:$144 sps:$4 sm:$0xff]   ;;  %v2034_v21 = vld [vmem:[#allocation4 + $0x68] ss:$144 sps:$4 sm:$0xff]  }
  0x31   :  { %1850 = vmatprep.subr.bf16.mxu1 %v2008_v25  ;;  %1110 = vmatprep.mubr.f32.mxu0 %v311_v26  ;;  %v191_v5 = vunpack.c.h.bf16 %v88_v61  ;;  %v329_v9 = vcombine.high %v208_v55, %v208_v55  ;;  %v172_v11 = vunpack.c.l.bf16 %v79_v60  ;;  %v190_v12 = vunpack.c.l.bf16 %v88_v61  ;;  %v89_v16 = vld [vmem:[#allocation4 + $0x188] sm:$0x33] }
  0x32   :  { %1886 = vmatprep.subr.bf16.mxu0 %v2012_v27  ;;  %481 = vmatmul.mubr.f32.vlgmr.msra.gmra.mrb[0].mxu1 %v234_v15  ;;  %v260_v7 = vcombine.high %v258_v62, %v258_v62  ;;  %v344_v8 = vcombine.high %v336_v63, %v336_v63  ;;  %v80_v15 = vld [vmem:[#allocation4 + $0x140] sm:$0x33]  ;;  %v268_v17 = vrot.slane %v204_v10, %v2181_v6  ;;  %v209_v27 = vld [vmem:[#allocation2 + $0x38] sm:$0xff]  ;;  %v192_v29 = vunpack.c.l.bf16 %v89_v16 }
  0x33   :  { %1111 = vmatmul.mubr.f32.vlgmr.msra.gmra.mrb[0].mxu0 %v309_v23  ;;  %1852 = vmatpush1.bf16.xpose.msra.mxu1 %v2010_v32  ;;  %v343_v18 = vrot.slane %v329_v9, %v2181_v6  ;;  %v175_v22 = vunpack.c.h.bf16 %v80_v15  ;;  %v193_v23 = vunpack.c.h.bf16 %v89_v16  ;;  %v261_v26 = vcombine.high %v204_v10, %v204_v10  ;;  %v81_v32 = vld [vmem:[#allocation4 + $0x148] sm:$0x33]  ;;  %v2057_v16 = vld [vmem:[#allocation4 + $0x44] ss:$144 sps:$4 sm:$0xff]  }
  0x34   :  { %1888 = vmatpush1.bf16.xpose.msra.mxu0 %v2014_v33  ;;  %490 = vmatprep.subr.mxu1 %v169_v34  ;;  %v276_v24 = vcombine.high %v268_v17, %v268_v17  ;;  %v174_v28 = vunpack.c.l.bf16 %v80_v15  ;;  %v90_v33 = vld [vmem:[#allocation4 + $0x190] sm:$0x33]  ;;  %v177_v38 = vunpack.c.h.bf16 %v81_v32  ;;  %v176_v44 = vunpack.c.l.bf16 %v81_v32 }
  0x35   :  { %1120 = vmatprep.subr.mxu0 %v187_v35  ;;  %550 = vmatprep.mubr.f32.mxu1 %v243_v36  ;;  %v345_v25 = vcombine.high %v343_v18, %v343_v18  ;;  %v275_v34 = vrot.slane %v261_v26, %v2181_v6  ;;  %v353_v35 = vrot.slane %v209_v27, %v2181_v6  ;;  %v2037_v36 = vld [vmem:[#allocation4 + $0x28] ss:$144 sps:$4 sm:$0xff]   ;;  %v195_v39 = vunpack.c.h.bf16 %v90_v33 }
  0x36   :  { %1180 = vmatprep.mubr.f32.mxu0 %v327_v37  ;;  %v2041_v37 = vld [vmem:[#allocation4 + $0x70] ss:$144 sps:$4 sm:$0xff]   ;;  %v194_v45 = vunpack.c.l.bf16 %v90_v33  ;;  %v310_v26 = vcombine.high %v2185_v20, %v2185_v20  ;;  %vm2123_vm9 = vmmov 0   ;;  %vm2124_vm11 = vmmov 1  }
  0x37   :  { %vm1741_vm14 = vcmask 1043456   ;;  %vm1737_vm15 = vcmask 162816  }
  0x3b   :  { %491 = vmatpush1.xpose.msra.mxu1 %v168_v40  ;;  %v277_v40 = vcombine.high %v275_v34, %v275_v34 }
  0x3c   :  { %1121 = vmatpush1.xpose.msra.mxu0 %v186_v41  ;;  %1854 = vmatprep.subr.bf16.mxu1 %v2015_v42  ;;  %v361_v41 = vcombine.high %v353_v35, %v353_v35  ;;  %v346_v42 = vcombine.high %v209_v27, %v209_v27 }
  0x3d   :  { %1890 = vmatprep.subr.bf16.mxu0 %v2018_v43  ;;  %v205_v43 = vld [vmem:[#allocation2 + $0x18] sm:$0xff] }
  0x3e   :  { %551 = vmatmul.mubr.f32.vlgmr.msra.gmra.mrb[0].mxu1 %v241_v30  ;;  %v2035_v30 = vld [vmem:[#allocation4 + $0x2c] ss:$144 sps:$4 sm:$0xff]  }
  0x3f   :  { %1181 = vmatmul.mubr.f32.vlgmr.msra.gmra.mrb[0].mxu0 %v319_v31  ;;  %1856 = vmatpush1.bf16.xpose.msra.mxu1 %v2017_v48  ;;  %v2039_v31 = vld [vmem:[#allocation4 + $0x74] ss:$144 sps:$4 sm:$0xff]  }
  0x40   :  { %1892 = vmatpush1.bf16.xpose.msra.mxu0 %v2020_v49  ;;  %560 = vmatprep.subr.mxu1 %v171_v50  ;;  %v82_v48 = vld [vmem:[#allocation4 + $0x150] sm:$0x33]  ;;  %v91_v49 = vld [vmem:[#allocation4 + $0x198] sm:$0x33]  ;;  %v285_v50 = vrot.slane %v205_v43, %v2181_v6 }
  0x41   :  { %1190 = vmatprep.subr.mxu0 %v189_v51  ;;  %620 = vmatprep.mubr.f32.mxu1 %v259_v52  ;;  %v360_v51 = vrot.slane %v346_v42, %v2181_v6  ;;  %v2045_v52 = vld [vmem:[#allocation4 + $0x30] ss:$144 sps:$4 sm:$0xff]   ;;  %v179_v54 = vunpack.c.h.bf16 %v82_v48  ;;  %v197_v55 = vunpack.c.h.bf16 %v91_v49  ;;  %v178_v60 = vunpack.c.l.bf16 %v82_v48 }
  0x42   :  { %1250 = vmatprep.mubr.f32.mxu0 %v328_v53  ;;  %v2048_v53 = vld [vmem:[#allocation4 + $0x78] ss:$144 sps:$4 sm:$0xff]   ;;  %v196_v61 = vunpack.c.l.bf16 %v91_v49 }
  0x47   :  { %561 = vmatpush1.xpose.msra.mxu1 %v170_v56  ;;  %v293_v56 = vcombine.high %v285_v50, %v285_v50 }
  0x48   :  { %1191 = vmatpush1.xpose.msra.mxu0 %v188_v57  ;;  %1858 = vmatprep.subr.bf16.mxu1 %v2021_v58  ;;  %v362_v57 = vcombine.high %v360_v51, %v360_v51  ;;  %v278_v58 = vcombine.high %v205_v43, %v205_v43 }
  0x49   :  { %1894 = vmatprep.subr.bf16.mxu0 %v2025_v59  ;;  %v210_v59 = vld [vmem:[#allocation2 + $0x40] sm:$0xff] }
  0x4a   :  { %621 = vmatmul.mubr.f32.vlgmr.msra.gmra.mrb[0].mxu1 %v251_v46  ;;  %v2043_v46 = vld [vmem:[#allocation4 + $0x34] ss:$144 sps:$4 sm:$0xff]  }
  0x4b   :  { %1251 = vmatmul.mubr.f32.vlgmr.msra.gmra.mrb[0].mxu0 %v326_v47  ;;  %1860 = vmatpush1.bf16.xpose.msra.mxu1 %v2023_v1  ;;  %v2046_v47 = vld [vmem:[#allocation4 + $0x7c] ss:$144 sps:$4 sm:$0xff]  }
  0x4c   :  { %1896 = vmatpush1.bf16.xpose.msra.mxu0 %v2027_v2  ;;  %630 = vmatprep.subr.mxu1 %v173_v3  ;;  %v83_v1 = vld [vmem:[#allocation4 + $0x158] sm:$0x33]  ;;  %v92_v2 = vld [vmem:[#allocation4 + $0x1a0] sm:$0x33]  ;;  %v292_v3 = vrot.slane %v278_v58, %v2181_v6 }
  0x4d   :  { %1260 = vmatprep.subr.mxu0 %v191_v5  ;;  %690 = vmatprep.mubr.f32.mxu1 %v260_v7  ;;  %v370_v5 = vrot.slane %v210_v59, %v2181_v6  ;;  %v2051_v7 = vld [vmem:[#allocation4 + $0x38] ss:$144 sps:$4 sm:$0xff]   ;;  %v181_v9 = vunpack.c.h.bf16 %v83_v1  ;;  %v199_v10 = vunpack.c.h.bf16 %v92_v2  ;;  %v198_v15 = vunpack.c.l.bf16 %v92_v2 }
  0x4e   :  { %1320 = vmatprep.mubr.f32.mxu0 %v344_v8  ;;  %v2055_v8 = vld [vmem:[#allocation4 + $0x80] ss:$144 sps:$4 sm:$0xff]  }
  0x53   :  { %631 = vmatpush1.xpose.msra.mxu1 %v172_v11  ;;  %v294_v11 = vcombine.high %v292_v3, %v292_v3 }
  0x54   :  { %1261 = vmatpush1.xpose.msra.mxu0 %v190_v12  ;;  %1862 = vmatprep.subr.bf16.mxu1 %v2029_v13  ;;  %v378_v12 = vcombine.high %v370_v5, %v370_v5  ;;  %v363_v13 = vcombine.high %v210_v59, %v210_v59 }
  0x55   :  { %1898 = vmatprep.subr.bf16.mxu0 %v2032_v14  ;;  %v180_v14 = vunpack.c.l.bf16 %v83_v1 }
  0x56   :  { %691 = vmatmul.mubr.f32.vlgmr.msra.gmra.mrb[0].mxu1 %v258_v62  ;;  %v2049_v62 = vld [vmem:[#allocation4 + $0x3c] ss:$144 sps:$4 sm:$0xff]  }
  0x57   :  { %1321 = vmatmul.mubr.f32.vlgmr.msra.gmra.mrb[0].mxu0 %v336_v63  ;;  %1864 = vmatpush1.bf16.xpose.msra.mxu1 %v2031_v19  ;;  %v2053_v63 = vld [vmem:[#allocation4 + $0x84] ss:$144 sps:$4 sm:$0xff]   ;;  %v93_v19 = vld [vmem:[#allocation4 + $0x1a8] sm:$0x33] }
  0x58   :  { %1900 = vmatpush1.bf16.xpose.msra.mxu0 %v2034_v21  ;;  %700 = vmatprep.subr.mxu1 %v175_v22  ;;  %v377_v21 = vrot.slane %v363_v13, %v2181_v6  ;;  %v2059_v22 = vld [vmem:[#allocation4 + $0x40] ss:$144 sps:$4 sm:$0xff]  }
  0x59   :  { %1330 = vmatprep.subr.mxu0 %v193_v23  ;;  %760 = vmatprep.mubr.f32.mxu1 %v276_v24  ;;  %v2062_v23 = vld [vmem:[#allocation4 + $0x88] ss:$144 sps:$4 sm:$0xff]  }
  0x5a   :  { %1390 = vmatprep.mubr.f32.mxu0 %v345_v25  ;;  %v201_v25 = vunpack.c.h.bf16 %v93_v19  ;;  %v379_v27 = vcombine.high %v377_v21, %v377_v21 }
  0x5f   :  { %701 = vmatpush1.xpose.msra.mxu1 %v174_v28  ;;  %v200_v28 = vunpack.c.l.bf16 %v93_v19 }
  0x60   :  { %1331 = vmatpush1.xpose.msra.mxu0 %v192_v29  ;;  %1866 = vmatprep.subr.bf16.mxu1 %v2035_v30  ;;  %v1824_v29 = vld [vmem:[%s2229_s2] ss:$0 sm:$0xff] }
  0x61   :  { %1902 = vmatprep.subr.bf16.mxu0 %v2039_v31 }
  0x62   :  { %761 = vmatmul.mubr.f32.vlgmr.msra.gmra.mrb[0].mxu1 %v268_v17  ;;  %v2060_v17 = vld [vmem:[#allocation4 + $0x8c] ss:$144 sps:$4 sm:$0xff]  }
  0x63   :  { %1391 = vmatmul.mubr.f32.vlgmr.msra.gmra.mrb[0].mxu0 %v343_v18  ;;  %1868 = vmatpush1.bf16.xpose.msra.mxu1 %v2037_v36  ;;  %v84_v18 = vld [vmem:[#allocation4 + $0x160] sm:$0x33] }
  0x64   :  { %1904 = vmatpush1.bf16.xpose.msra.mxu0 %v2041_v37  ;;  %770 = vmatprep.subr.mxu1 %v177_v38  ;;  %v183_v24 = vunpack.c.h.bf16 %v84_v18  ;;  %v182_v6 = vunpack.c.l.bf16 %v84_v18  ;;  %v1688_v37 = vand.u32 127, %v231_v0  ;;  %v1685_v38 = vadd.s32 8, %v2178_v4 }
  0x65   :  { %1400 = vmatprep.subr.mxu0 %v195_v39  ;;  %830 = vmatprep.mubr.f32.mxu1 %v277_v40  ;;  %v2121_v39 = vmov 0.0|0.0   ;;  %v2122_v40 = vmov 0.0   ;;  %v1686_v0 = vadd.s32 16, %v2178_v4 }
  0x66   :  { %1460 = vmatprep.mubr.f32.mxu0 %v361_v41  ;;  %vm1722_vm1 = vcmp.ge.s32.totalorder %v1688_v37, 10  ;;  %vm1723_vm2 = vcmp.lt.s32.totalorder %v1688_v37, 20  ;;  %vm1693_vm3 = vcmp.lt.s32.totalorder %v1685_v38, 10  ;;  %vm1699_vm4 = vcmp.lt.s32.totalorder %v1688_v37, 10 }
  0x67   :  { %vm1714_vm5 = vcmp.ge.s32.totalorder %v1685_v38, 10  ;;  %vm2212_vm6 = vmand %vm1722_vm1, %vm1723_vm2  ;;  %vm1718_vm10 = vcmp.lt.s32.totalorder %v1686_v0, 20 }
  0x68   :  { %vm1702_vm7 = vmand %vm1693_vm3, %vm1699_vm4 }
  0x69   :  { %v1826_v41 = vsel %vm1702_vm7, 1.0, %v2122_v40  ;;  %vm1726_vm8 = vmand %vm1714_vm5, %vm2212_vm6 }
  0x6a   :  { %v1827_v42 = vsel %vm1726_vm8, 1.0, %v2122_v40  ;;  %vm1919_vm12 = vmpackc.low %vm2124_vm11, %vm1699_vm4 }
  0x6b   :  { %771 = vmatpush1.xpose.msra.mxu1 %v176_v44  ;;  %v1735_v43 = vadd.f32 %v1827_v42, %v1826_v41  ;;  %v2125_v44 = vmov 1.0   ;;  %vm1727_vm13 = vmand %vm1718_vm10, %vm2212_vm6 }
  0x6c   :  { %1401 = vmatpush1.xpose.msra.mxu0 %v194_v45  ;;  %1870 = vmatprep.subr.bf16.mxu1 %v2043_v46  ;;  %v1828_v46 = vsel %vm1727_vm13, 1.0, %v2122_v40 }
  0x6d   :  { %1906 = vmatprep.subr.bf16.mxu0 %v2046_v47  ;;  %v1918_v45 = vpack.c.bf16 %v1735_v43, %v2125_v44 }
  0x6e   :  { %831 = vmatmul.mubr.f32.vlgmr.msra.gmra.mrb[0].mxu1 %v275_v34 }
  0x6f   :  { %1461 = vmatmul.mubr.f32.vlgmr.msra.gmra.mrb[0].mxu0 %v353_v35  ;;  %1872 = vmatpush1.bf16.xpose.msra.mxu1 %v2045_v52 }
  0x70   :  { %1908 = vmatpush1.bf16.xpose.msra.mxu0 %v2048_v53  ;;  %840 = vmatprep.subr.mxu1 %v179_v54 }
  0x71   :  { %1470 = vmatprep.subr.mxu0 %v197_v55  ;;  %900 = vmatprep.mubr.f32.mxu1 %v293_v56 }
  0x72   :  { %1530 = vmatprep.mubr.f32.mxu0 %v362_v57 }
  0x77   :  { %841 = vmatpush1.xpose.msra.mxu1 %v178_v60 }
  0x78   :  { %1471 = vmatpush1.xpose.msra.mxu0 %v196_v61  ;;  %1874 = vmatprep.subr.bf16.mxu1 %v2049_v62 }
  0x79   :  { %1910 = vmatprep.subr.bf16.mxu0 %v2053_v63 }
  0x7a   :  { %901 = vmatmul.mubr.f32.vlgmr.msra.gmra.mrb[0].mxu1 %v285_v50 }
  0x7b   :  { %1531 = vmatmul.mubr.f32.vlgmr.msra.gmra.mrb[0].mxu0 %v360_v51  ;;  %1876 = vmatpush1.bf16.xpose.msra.mxu1 %v2051_v7 }
  0x7c   :  { %1912 = vmatpush1.bf16.xpose.msra.mxu0 %v2055_v8  ;;  %910 = vmatprep.subr.mxu1 %v181_v9 }
  0x7d   :  { %1540 = vmatprep.subr.mxu0 %v199_v10  ;;  %970 = vmatprep.mubr.f32.mxu1 %v294_v11 }
  0x7e   :  { %1600 = vmatprep.mubr.f32.mxu0 %v378_v12 }
  0x83   :  { %911 = vmatpush1.xpose.msra.mxu1 %v180_v14 }
  0x84   :  { %1541 = vmatpush1.xpose.msra.mxu0 %v198_v15  ;;  %1878 = vmatprep.subr.bf16.mxu1 %v2057_v16 }
  0x85   :  { %1914 = vmatprep.subr.bf16.mxu0 %v2060_v17 }
  0x86   :  { %971 = vmatmul.mubr.f32.vlgmr.msra.gmra.mrb[0].mxu1 %v292_v3 }
  0x87   :  { %1601 = vmatmul.mubr.f32.vlgmr.msra.gmra.mrb[0].mxu0 %v370_v5  ;;  %1880 = vmatpush1.bf16.xpose.msra.mxu1 %v2059_v22 }
  0x88   :  { %1916 = vmatpush1.bf16.xpose.msra.mxu0 %v2062_v23  ;;  %980 = vmatprep.subr.mxu1 %v183_v24 }
  0x89   :  { %1610 = vmatprep.subr.mxu0 %v201_v25  ;;  %1040 = vmatprep.mubr.f32.mxu1 %v310_v26 }
  0x8a   :  { %1670 = vmatprep.mubr.f32.mxu0 %v379_v27 }
  0x8f   :  { %981 = vmatpush1.xpose.msra.mxu1 %v182_v6 }
  0x90   :  { %1611 = vmatpush1.xpose.msra.mxu0 %v200_v28  ;;  %1917 = vmatprep.subr.bf16.mxu1 %v2121_v39 }
  0x92   :  { %1041 = vmatmul.mubr.f32.vlgmr.msra.gmra.mrb[0].mxu1 %v2185_v20 }
  0x93   :  { %1671 = vmatmul.mubr.f32.vlgmr.msra.gmra.mrb[0].mxu0 %v377_v21  ;;  %1842 = vmatprep.mubr.msk.f32.mxu1 %vm2123_vm9, %v2122_v40 }
  0x94   :  { %1920 = vmatpush3.bf16.msk.msra.mxu1 %vm1919_vm12, %v1918_v45 }
  0x95   :  { %1840 = vmatprep.subr.mxu1 %v2122_v40 }
  0x98   :  { %1841 = vmatpush3.msk.msra.mxu1 %vm1741_vm14, %v1828_v46 }
 0x165   :  { %v1042_v30 = vpop.f32.mrb[0].mxu1 }
 0x166   :  { %v1672_v31 = vpop.f32.mrb[0].mxu0  ;;  %v1921_v32 = vadd.f32 %v1824_v29, %v1042_v30  ;;  %v1044_v33 = vpop.f32.mrb[1].mxu1 }
 0x167   :  { %v1674_v34 = vpop.f32.mrb[1].mxu0 }
 0x168   :  { %v1922_v35 = vadd.f32 %v1921_v32, %v1672_v31 }
 0x16a   :  { %v1677_v36 = vsel %vm1676_vm0, %v1922_v35, -inf }
 0x16b   :  { %1678 = vmax.xlane.f32.xlu0 %v1677_v36 }
 0x1f8   :  { %v1679_v47 = vpop.xlane.xlu0 %1678 }
 0x1f9   :  { %v1680_v4 = vsub.f32 %v1922_v35, %v1679_v47 }
 0x1fb   :  { %v1681_v48 = vmul.f32 1.442695, %v1680_v4 }
 0x1fd   :  { %2064 = vpow2.f32 %v1681_v48 }
 0x207   :  { %v2065_v49 = vpop.eup %2064 }
 0x208   :  { %1843 = vmatmul.mubr.msk.f32.vlgmr.msra.gmra.mrb[2].mxu1 %vm1737_vm15, %v2065_v49 }
 0x2db   :  { %v1811_v50 = vpop.f32.mrb[2].mxu1 }
 0x2dc   :  { %2066 = vrcp.f32 %v1811_v50  ;;  %v1844_v51 = vpop.f32.mrb[3].mxu1 }
 0x2e6   :  { %v2067_v52 = vpop.eup %2066 }
 0x2e7   :  { %v1816_v53 = vmul.f32 %v2067_v52, %v2065_v49 }
 0x2e9   :  { %1817 = vst.msk [vmem:[%s2230_s3] sm:$0x3] %vm1676_vm0, %v1816_v53 }
 0x2ea   :  { %1822 = vsyncpa [#allocation3], 1 }
 0x2eb   :  { %1823 = vsyncpa [#allocation5], 1 }

</bundles_post_ra>
